<compile_context>
chip_gen: v5e
topology: v5e:2x2
jax: 0.10.0
libtpu: 0.0.40
codegen_flags: <defaults>
</compile_context>

<pallas_src>
import functools

import jax
import jax.numpy as jnp
from jax.experimental import pallas as pl
from jax.experimental.pallas import tpu as pltpu


_MAX_TBC = 256          # rows per grid step (diminishing returns past ~1 MiB tiles)


def _round_up(x: int, m: int) -> int:
    return ((x + m - 1) // m) * m


@functools.lru_cache(maxsize=1)
def _vmem_budget():
    """(tile_budget_bytes, scoped_vmem_limit_bytes), generation-aware."""
    cap = 64 * 1024 * 1024
    try:
        cap = int(pltpu.get_tpu_info().vmem_capacity_bytes)
    except Exception:
        pass
    if cap >= 128 * 1024 * 1024:          # v5e / v6e: room for bigger tiles
        return 48 * 1024 * 1024, 64 * 1024 * 1024
    return 24 * 1024 * 1024, 32 * 1024 * 1024   # v7x: 64 MiB physical VMEM


def _choose_tiles(bc: int, k: int, n: int, itemsize: int):
    """Pick (TBC, TN, vmem_limit) honoring (8,128) rules and an honest VMEM budget."""
    budget, vmem_limit = _vmem_budget()
    smul = max(8, 32 // itemsize)          # dense sublane multiple for this dtype
    k_pad = _round_up(k, smul)             # K pads to the sublane multiple in VMEM

    def per_row(tn):
        tn_pad = _round_up(tn, 128)
        # double-buffered input (k_pad x tn) + output (1 x tn) slabs per BC row,
        # plus one single-buffered f32 accumulator row.
        return 2 * (k_pad + 1) * tn_pad * itemsize + tn_pad * 4

    # Prefer tn = N (contiguous innermost HBM dim -> long linear DMA bursts);
    # only split N when even `smul` full-N rows exceed the budget.
    tn = n
    if n > 128 and per_row(n) * smul > budget:
        tn = 128
        while tn * 2 <= n and per_row(tn * 2) * smul <= budget:
            tn *= 2

    tbc = max(1, budget // per_row(tn))
    tbc = min(tbc, _MAX_TBC, bc)
    if tbc < bc:
        # dtype-aware sublane rounding -> dense (unmasked) output stores.
        tbc = max(smul, (tbc // smul) * smul)
        tbc = min(tbc, bc)

    # Guarantee >=2 grid steps along a "parallel" axis when legal, so v7x's two
    # TensorCores both get work.  Harmless on single-TC v5e/v6e.
    if tbc >= bc and tn >= n:
        if bc >= 2 * smul:
            tbc = min(_round_up((bc + 1) // 2, smul), bc)
        elif n >= 2 * 128:
            tn = _round_up((n + 1) // 2, 128)

    return tbc, tn, vmem_limit


def _make_agg_kernel(oper: str, k: int):
    """Build a Pallas kernel reducing axis 1 of a (TBC, K, TN) block."""
    inv_k = 1.0 / float(k)

    def kernel(x_ref, o_ref):
        if oper == "max":
            o_ref[...] = jnp.max(x_ref[...], axis=1).astype(o_ref.dtype)
            return
        # sum / mean: slice-accumulate over K into an f32 (TBC, TN) accumulator.
        # Avoids materializing a widened copy of the whole tile for bf16 input
        # and keeps the reduce as lane-dense VPU adds (hidden under DMA).
        acc = x_ref[:, 0, :].astype(jnp.float32)
        for kk in range(1, k):                     # K is a small static constant
            acc = acc + x_ref[:, kk, :].astype(jnp.float32)
        if oper == "mean":
            acc = acc * jnp.float32(inv_k)
        o_ref[...] = acc.astype(o_ref.dtype)

    return kernel


@functools.partial(jax.jit, static_argnames=("oper",))
def aggregator_forward(x: jax.Array, oper: str) -> jax.Array:
    """Pallas equivalent of Aggregator(oper)(x, dim=2) for 4-D x = (B, C, K, N)."""
    assert oper in ("mean", "sum", "max")
    B, C, K, N = x.shape
    BC = B * C
    xf = x.reshape(BC, K, N)

    itemsize = x.dtype.itemsize
    tbc, tn, vmem_limit = _choose_tiles(BC, K, N, itemsize)
    grid = (pl.cdiv(BC, tbc), pl.cdiv(N, tn))

    cost = pl.CostEstimate(
        flops=BC * K * N,
        transcendentals=0,
        bytes_accessed=(BC * K * N + BC * N) * itemsize,
    )

    out = pl.pallas_call(
        _make_agg_kernel(oper, K),
        out_shape=jax.ShapeDtypeStruct((BC, N), x.dtype),
        grid=grid,
        in_specs=[pl.BlockSpec((tbc, K, tn), lambda i, j: (i, 0, j))],
        out_specs=pl.BlockSpec((tbc, tn), lambda i, j: (i, j)),
        compiler_params=pltpu.CompilerParams(
            dimension_semantics=("parallel", "parallel"),
            vmem_limit_bytes=vmem_limit,
        ),
        cost_estimate=cost,
    )(xf)

    return out.reshape(B, C, N)


def _reference(x, oper):
    if oper == "mean":
        return jnp.mean(x.astype(jnp.float32), axis=2).astype(x.dtype)
    elif oper == "sum":
        return jnp.sum(x.astype(jnp.float32), axis=2).astype(x.dtype)
    else:
        return jnp.max(x, axis=2)


def _check(x, oper, atol, rtol):
    y = aggregator_forward(x, oper)
    jax.block_until_ready(y)
    ref = _reference(x, oper)
    return y.shape == ref.shape and bool(
        jnp.allclose(y.astype(jnp.float32), ref.astype(jnp.float32),
                     atol=atol, rtol=rtol)
    )


if __name__ == "__main__":
    key = jax.random.PRNGKey(0)
    # (batch=2, channels=4, K neighbors=8, N points=16)
    x_small_f32 = jax.random.normal(key, (2, 4, 8, 16), dtype=jnp.float32)
    x_small_bf16 = x_small_f32.astype(jnp.bfloat16)
    # Moderate shape exercising multi-step grid / partial BC blocks / full-N tiles.
    x_mid_f32 = jax.random.normal(jax.random.PRNGKey(1), (3, 25, 20, 200),
                                  dtype=jnp.float32)
    x_mid_bf16 = jax.random.normal(jax.random.PRNGKey(2), (2, 16, 20, 160),
                                   dtype=jnp.float32).astype(jnp.bfloat16)

    ok = True
    for oper in ("mean", "sum", "max"):
        ok = ok and _check(x_small_f32, oper, atol=1e-5, rtol=1e-5)
        ok = ok and _check(x_mid_f32, oper, atol=1e-4, rtol=1e-4)
        ok = ok and _check(x_small_bf16, oper, atol=5e-2, rtol=5e-2)
        ok = ok and _check(x_mid_bf16, oper, atol=5e-2, rtol=5e-2)

    print("KERNEL_OK" if ok else "KERNEL_MISMATCH")
</pallas_src>

<mosaic_0001>
module attributes {stable_mosaic.version = 11 : i64} {
  func.func @kernel(%arg0: i32, %arg1: i32, %arg2: memref<8x8x16xf32, #tpu.memory_space<vmem>>, %arg3: memref<8x16xf32, #tpu.memory_space<vmem>>) attributes {dimension_semantics = [#tpu.dimension_semantics<parallel>, #tpu.dimension_semantics<parallel>], iteration_bounds = array<i64: 1, 1>, scalar_prefetch = 0 : i64, scratch_operands = 0 : i64, tpu.core_type = #tpu.core_type<tc>, window_params = [{transform_indices = @transform_0, window_bounds = array<i64: 8, 8, 16>}, {transform_indices = @transform_1, window_bounds = array<i64: 8, 16>}]} {
    %c0 = arith.constant 0 : index
    %c0_0 = arith.constant 0 : index
    %c0_1 = arith.constant 0 : index
    %0 = vector.load %arg2[%c0, %c0_0, %c0_1] : memref<8x8x16xf32, #tpu.memory_space<vmem>>, vector<8x1x16xf32>
    %1 = vector.shape_cast %0 : vector<8x1x16xf32> to vector<8x16xf32>
    %c0_2 = arith.constant 0 : index
    %c1 = arith.constant 1 : index
    %c0_3 = arith.constant 0 : index
    %2 = vector.load %arg2[%c0_2, %c1, %c0_3] : memref<8x8x16xf32, #tpu.memory_space<vmem>>, vector<8x1x16xf32>
    %3 = vector.shape_cast %2 : vector<8x1x16xf32> to vector<8x16xf32>
    %4 = arith.addf %1, %3 : vector<8x16xf32>
    %c0_4 = arith.constant 0 : index
    %c2 = arith.constant 2 : index
    %c0_5 = arith.constant 0 : index
    %5 = vector.load %arg2[%c0_4, %c2, %c0_5] : memref<8x8x16xf32, #tpu.memory_space<vmem>>, vector<8x1x16xf32>
    %6 = vector.shape_cast %5 : vector<8x1x16xf32> to vector<8x16xf32>
    %7 = arith.addf %4, %6 : vector<8x16xf32>
    %c0_6 = arith.constant 0 : index
    %c3 = arith.constant 3 : index
    %c0_7 = arith.constant 0 : index
    %8 = vector.load %arg2[%c0_6, %c3, %c0_7] : memref<8x8x16xf32, #tpu.memory_space<vmem>>, vector<8x1x16xf32>
    %9 = vector.shape_cast %8 : vector<8x1x16xf32> to vector<8x16xf32>
    %10 = arith.addf %7, %9 : vector<8x16xf32>
    %c0_8 = arith.constant 0 : index
    %c4 = arith.constant 4 : index
    %c0_9 = arith.constant 0 : index
    %11 = vector.load %arg2[%c0_8, %c4, %c0_9] : memref<8x8x16xf32, #tpu.memory_space<vmem>>, vector<8x1x16xf32>
    %12 = vector.shape_cast %11 : vector<8x1x16xf32> to vector<8x16xf32>
    %13 = arith.addf %10, %12 : vector<8x16xf32>
    %c0_10 = arith.constant 0 : index
    %c5 = arith.constant 5 : index
    %c0_11 = arith.constant 0 : index
    %14 = vector.load %arg2[%c0_10, %c5, %c0_11] : memref<8x8x16xf32, #tpu.memory_space<vmem>>, vector<8x1x16xf32>
    %15 = vector.shape_cast %14 : vector<8x1x16xf32> to vector<8x16xf32>
    %16 = arith.addf %13, %15 : vector<8x16xf32>
    %c0_12 = arith.constant 0 : index
    %c6 = arith.constant 6 : index
    %c0_13 = arith.constant 0 : index
    %17 = vector.load %arg2[%c0_12, %c6, %c0_13] : memref<8x8x16xf32, #tpu.memory_space<vmem>>, vector<8x1x16xf32>
    %18 = vector.shape_cast %17 : vector<8x1x16xf32> to vector<8x16xf32>
    %19 = arith.addf %16, %18 : vector<8x16xf32>
    %c0_14 = arith.constant 0 : index
    %c7 = arith.constant 7 : index
    %c0_15 = arith.constant 0 : index
    %20 = vector.load %arg2[%c0_14, %c7, %c0_15] : memref<8x8x16xf32, #tpu.memory_space<vmem>>, vector<8x1x16xf32>
    %21 = vector.shape_cast %20 : vector<8x1x16xf32> to vector<8x16xf32>
    %22 = arith.addf %19, %21 : vector<8x16xf32>
    %cst = arith.constant 1.250000e-01 : f32
    %23 = vector.broadcast %cst : f32 to vector<8x16xf32>
    %24 = arith.mulf %22, %23 : vector<8x16xf32>
    %c0_16 = arith.constant 0 : index
    %c0_17 = arith.constant 0 : index
    %25 = vector.load %arg3[%c0_16, %c0_17] : memref<8x16xf32, #tpu.memory_space<vmem>>, vector<8x16xf32>
    tpu.vector_store %arg3[%c0_16, %c0_17], %24 {strides = array<i32>} : memref<8x16xf32, #tpu.memory_space<vmem>>, vector<8x16xf32>,
    return
  }
  func.func @transform_0(%arg0: i32, %arg1: i32) -> (i32, i32, i32) {
    %c0_i32 = arith.constant 0 : i32
    %c0_i32_0 = arith.constant 0 : i32
    return %arg0, %c0_i32, %arg1 : i32, i32, i32
  }
  func.func @transform_1(%arg0: i32, %arg1: i32) -> (i32, i32) {
    %c0_i32 = arith.constant 0 : i32
    return %arg0, %arg1 : i32, i32
  }
}

</mosaic_0001>

<bundles_post_ra>
// kernel: aggregator_forward.1
= control target key start
LH: loop header
LB: loop body
LE: loop exit
PB: predicated region body
PF: predicated region fallthrough
CT: control target
= control target key end

     0   :  { %6 = vsyncpa [#allocation3], 0  ;;  %s279_s0 = inlined_call_operand.hbm [shape: f32[8,8,16], index: 0, kind: input, shape index: {}]   ;;  %s280_s1 = inlined_call_operand.hbm [shape: f32[8,16], index: 1, kind: output, shape index: {}]  }
   0x1   :  { %7 = vsyncpa [#allocation4], 0  ;;  %s12_s8 = sshll.u32 %s279_s0, 4  ;;  %s258_s9 = smov [#allocation2]   ;;  %s13_s8 = int_to_ptr.hbm [resolvable:$true] %s12_s8 }
   0x2   :  { %s14_s10 = sshll.u32 %s258_s9, 4  ;;  %s259_s11 = smov 128   ;;  %s15_s10 = int_to_ptr.vmem [resolvable:$true] %s14_s10 }
   0x3   :  { %s260_s12 = smov 8  }
   0x4   :  { %20 = dma.hbm_to_vmem [thread:$0]  %s13_s8, 1024, %s15_s10, [#allocation3], %s259_s11, %s259_s11, %s260_s12  }
   0x5   :  { %254 = dma.done.wait [#allocation3], 1024  }
   0x6   :  { %255 = vsyncadd [#allocation3], 4294966272  ;;  %v25_v0 = vld [vmem:[#allocation2] sm:$0x1]  ;;  %v26_v1 = vld [vmem:[#allocation2 + $0x8] sm:$0x1] }
   0x7   :  { %v27_v2 = vld [vmem:[#allocation2 + $0x10] sm:$0x1]  ;;  %v28_v3 = vld [vmem:[#allocation2 + $0x18] sm:$0x1]  ;;  %v29_v4 = vld [vmem:[#allocation2 + $0x20] sm:$0x1] }
   0x8   :  { %v30_v5 = vld [vmem:[#allocation2 + $0x28] sm:$0x1]  ;;  %v31_v6 = vld [vmem:[#allocation2 + $0x30] sm:$0x1]  ;;  %v32_v7 = vld [vmem:[#allocation2 + $0x38] sm:$0x1] }
   0x9   :  { %v33_v8 = vld [vmem:[#allocation2 + $0x1] sm:$0x1]  ;;  %v34_v9 = vld [vmem:[#allocation2 + $0x9] sm:$0x1]  ;;  %v35_v10 = vld [vmem:[#allocation2 + $0x11] sm:$0x1] }
   0xa   :  { %v36_v11 = vld [vmem:[#allocation2 + $0x19] sm:$0x1]  ;;  %v41_v12 = vadd.f32 %v33_v8, %v25_v0  ;;  %v37_v13 = vld [vmem:[#allocation2 + $0x21] sm:$0x1]  ;;  %v38_v14 = vld [vmem:[#allocation2 + $0x29] sm:$0x1]  ;;  %v42_v16 = vadd.f32 %v34_v9, %v26_v1  ;;  %v43_v17 = vadd.f32 %v35_v10, %v27_v2 }
   0xb   :  { %v39_v15 = vld [vmem:[#allocation2 + $0x31] sm:$0x1]  ;;  %v44_v18 = vadd.f32 %v36_v11, %v28_v3  ;;  %v40_v19 = vld [vmem:[#allocation2 + $0x39] sm:$0x1]  ;;  %v45_v20 = vadd.f32 %v37_v13, %v29_v4  ;;  %v46_v21 = vadd.f32 %v38_v14, %v30_v5  ;;  %v49_v23 = vld [vmem:[#allocation2 + $0x2] sm:$0x1] }
   0xc   :  { %v47_v22 = vadd.f32 %v39_v15, %v31_v6  ;;  %v50_v24 = vld [vmem:[#allocation2 + $0xa] sm:$0x1]  ;;  %v48_v25 = vadd.f32 %v40_v19, %v32_v7  ;;  %v51_v26 = vld [vmem:[#allocation2 + $0x12] sm:$0x1]  ;;  %v52_v27 = vld [vmem:[#allocation2 + $0x1a] sm:$0x1]  ;;  %v57_v29 = vadd.f32 %v49_v23, %v41_v12 }
   0xd   :  { %v53_v28 = vld [vmem:[#allocation2 + $0x22] sm:$0x1]  ;;  %v58_v30 = vadd.f32 %v50_v24, %v42_v16  ;;  %v54_v31 = vld [vmem:[#allocation2 + $0x2a] sm:$0x1]  ;;  %v55_v32 = vld [vmem:[#allocation2 + $0x32] sm:$0x1]  ;;  %v59_v34 = vadd.f32 %v51_v26, %v43_v17  ;;  %v60_v35 = vadd.f32 %v52_v27, %v44_v18 }
   0xe   :  { %v56_v33 = vld [vmem:[#allocation2 + $0x3a] sm:$0x1]  ;;  %v61_v36 = vadd.f32 %v53_v28, %v45_v20  ;;  %v62_v37 = vadd.f32 %v54_v31, %v46_v21  ;;  %v63_v38 = vadd.f32 %v55_v32, %v47_v22  ;;  %v65_v40 = vld [vmem:[#allocation2 + $0x3] sm:$0x1]  ;;  %v66_v41 = vld [vmem:[#allocation2 + $0xb] sm:$0x1] }
   0xf   :  { %v64_v39 = vadd.f32 %v56_v33, %v48_v25  ;;  %v67_v42 = vld [vmem:[#allocation2 + $0x13] sm:$0x1]  ;;  %v68_v43 = vld [vmem:[#allocation2 + $0x1b] sm:$0x1]  ;;  %v69_v44 = vld [vmem:[#allocation2 + $0x23] sm:$0x1]  ;;  %v73_v46 = vadd.f32 %v65_v40, %v57_v29  ;;  %v74_v47 = vadd.f32 %v66_v41, %v58_v30 }
  0x10   :  { %v70_v45 = vld [vmem:[#allocation2 + $0x2b] sm:$0x1]  ;;  %v75_v48 = vadd.f32 %v67_v42, %v59_v34  ;;  %v71_v49 = vld [vmem:[#allocation2 + $0x33] sm:$0x1]  ;;  %v72_v50 = vld [vmem:[#allocation2 + $0x3b] sm:$0x1]  ;;  %v76_v51 = vadd.f32 %v68_v43, %v60_v35  ;;  %v77_v52 = vadd.f32 %v69_v44, %v61_v36 }
  0x11   :  { %v78_v53 = vadd.f32 %v70_v45, %v62_v37  ;;  %v81_v54 = vld [vmem:[#allocation2 + $0x4] sm:$0x1]  ;;  %v79_v55 = vadd.f32 %v71_v49, %v63_v38  ;;  %v80_v56 = vadd.f32 %v72_v50, %v64_v39  ;;  %v82_v57 = vld [vmem:[#allocation2 + $0xc] sm:$0x1]  ;;  %v83_v58 = vld [vmem:[#allocation2 + $0x14] sm:$0x1] }
  0x12   :  { %v84_v59 = vld [vmem:[#allocation2 + $0x1c] sm:$0x1]  ;;  %v89_v60 = vadd.f32 %v81_v54, %v73_v46  ;;  %v85_v61 = vld [vmem:[#allocation2 + $0x24] sm:$0x1]  ;;  %v86_v62 = vld [vmem:[#allocation2 + $0x2c] sm:$0x1]  ;;  %v90_v0 = vadd.f32 %v82_v57, %v74_v47  ;;  %v91_v1 = vadd.f32 %v83_v58, %v75_v48 }
  0x13   :  { %v87_v63 = vld [vmem:[#allocation2 + $0x34] sm:$0x1]  ;;  %v92_v2 = vadd.f32 %v84_v59, %v76_v51  ;;  %v88_v3 = vld [vmem:[#allocation2 + $0x3c] sm:$0x1]  ;;  %v93_v4 = vadd.f32 %v85_v61, %v77_v52  ;;  %v94_v5 = vadd.f32 %v86_v62, %v78_v53  ;;  %v97_v7 = vld [vmem:[#allocation2 + $0x5] sm:$0x1] }
  0x14   :  { %v95_v6 = vadd.f32 %v87_v63, %v79_v55  ;;  %v98_v8 = vld [vmem:[#allocation2 + $0xd] sm:$0x1]  ;;  %v96_v9 = vadd.f32 %v88_v3, %v80_v56  ;;  %v99_v10 = vld [vmem:[#allocation2 + $0x15] sm:$0x1]  ;;  %v100_v11 = vld [vmem:[#allocation2 + $0x1d] sm:$0x1]  ;;  %v105_v13 = vadd.f32 %v97_v7, %v89_v60 }
  0x15   :  { %v101_v12 = vld [vmem:[#allocation2 + $0x25] sm:$0x1]  ;;  %v106_v14 = vadd.f32 %v98_v8, %v90_v0  ;;  %v102_v15 = vld [vmem:[#allocation2 + $0x2d] sm:$0x1]  ;;  %v103_v16 = vld [vmem:[#allocation2 + $0x35] sm:$0x1]  ;;  %v107_v18 = vadd.f32 %v99_v10, %v91_v1  ;;  %v108_v19 = vadd.f32 %v100_v11, %v92_v2 }
  0x16   :  { %v104_v17 = vld [vmem:[#allocation2 + $0x3d] sm:$0x1]  ;;  %v109_v20 = vadd.f32 %v101_v12, %v93_v4  ;;  %vm162_vm0 = vcmask 1041409   ;;  %v110_v21 = vadd.f32 %v102_v15, %v94_v5  ;;  %v111_v22 = vadd.f32 %v103_v16, %v95_v6  ;;  %v113_v24 = vld [vmem:[#allocation2 + $0x6] sm:$0x1]  ;;  %s261_s0 = smov [#allocation5]  }
  0x17   :  { %v112_v23 = vadd.f32 %v104_v17, %v96_v9  ;;  %v114_v25 = vld [vmem:[#allocation2 + $0xe] sm:$0x1]  ;;  %v115_v26 = vld [vmem:[#allocation2 + $0x16] sm:$0x1]  ;;  %v116_v27 = vld [vmem:[#allocation2 + $0x1e] sm:$0x1]  ;;  %v121_v30 = vadd.f32 %v113_v24, %v105_v13 }
  0x18   :  { %v117_v28 = vld [vmem:[#allocation2 + $0x26] sm:$0x1]  ;;  %v118_v29 = vld [vmem:[#allocation2 + $0x2e] sm:$0x1]  ;;  %v122_v31 = vadd.f32 %v114_v25, %v106_v14  ;;  %v123_v32 = vadd.f32 %v115_v26, %v107_v18  ;;  %v119_v33 = vld [vmem:[#allocation2 + $0x36] sm:$0x1]  ;;  %v124_v35 = vadd.f32 %v116_v27, %v108_v19 }
  0x19   :  { %v120_v34 = vld [vmem:[#allocation2 + $0x3e] sm:$0x1]  ;;  %v125_v36 = vadd.f32 %v117_v28, %v109_v20  ;;  %v126_v37 = vadd.f32 %v118_v29, %v110_v21  ;;  %v129_v38 = vld [vmem:[#allocation2 + $0x7] sm:$0x1]  ;;  %v127_v39 = vadd.f32 %v119_v33, %v111_v22  ;;  %v130_v41 = vld [vmem:[#allocation2 + $0xf] sm:$0x1] }
  0x1a   :  { %v128_v40 = vadd.f32 %v120_v34, %v112_v23  ;;  %v131_v42 = vld [vmem:[#allocation2 + $0x17] sm:$0x1]  ;;  %v132_v43 = vld [vmem:[#allocation2 + $0x1f] sm:$0x1]  ;;  %v137_v44 = vadd.f32 %v129_v38, %v121_v30  ;;  %v133_v45 = vld [vmem:[#allocation2 + $0x27] sm:$0x1]  ;;  %v138_v48 = vadd.f32 %v130_v41, %v122_v31 }
  0x1b   :  { %v134_v46 = vld [vmem:[#allocation2 + $0x2f] sm:$0x1]  ;;  %v135_v47 = vld [vmem:[#allocation2 + $0x37] sm:$0x1]  ;;  %v139_v49 = vadd.f32 %v131_v42, %v123_v32  ;;  %v140_v50 = vadd.f32 %v132_v43, %v124_v35  ;;  %v136_v51 = vld [vmem:[#allocation2 + $0x3f] sm:$0x1]  ;;  %v141_v52 = vadd.f32 %v133_v45, %v125_v36 }
  0x1c   :  { %v142_v53 = vadd.f32 %v134_v46, %v126_v37  ;;  %v143_v54 = vadd.f32 %v135_v47, %v127_v39  ;;  %v145_v55 = vmul.f32 0.125, %v137_v44  ;;  %v144_v56 = vadd.f32 %v136_v51, %v128_v40  ;;  %s190_s13 = sshll.u32 %s261_s0, 4  ;;  %s192_s16 = sshll.u32 %s280_s1, 4  ;;  %s191_s13 = int_to_ptr.vmem [resolvable:$true] %s190_s13  ;;  %s193_s16 = int_to_ptr.hbm [resolvable:$true] %s192_s16 }
  0x1d   :  { %v146_v57 = vmul.f32 0.125, %v138_v48  ;;  %v147_v58 = vmul.f32 0.125, %v139_v49  ;;  %v148_v59 = vmul.f32 0.125, %v140_v50  ;;  %v149_v60 = vmul.f32 0.125, %v141_v52 }
  0x1e   :  { %v150_v61 = vmul.f32 0.125, %v142_v53  ;;  %v151_v62 = vmul.f32 0.125, %v143_v54  ;;  %vm165_vm1 = vcmask 1042434   ;;  %v152_v63 = vmul.f32 0.125, %v144_v56 }
  0x1f   :  { %v161_v0 = vrot.slane %v146_v57, 7  ;;  %v164_v1 = vrot.slane %v147_v58, 6  ;;  %v167_v2 = vrot.slane %v148_v59, 5  ;;  %vm168_vm2 = vcmask 1043459  }
  0x20   :  { %v170_v3 = vrot.slane %v149_v60, 4  ;;  %vm171_vm3 = vcmask 1044484   ;;  %v173_v5 = vrot.slane %v150_v61, 3  ;;  %vm174_vm4 = vcmask 1045509  }
  0x21   :  { %v163_v4 = vsel %vm162_vm0, %v161_v0, %v145_v55  ;;  %v176_v7 = vrot.slane %v151_v62, 2  ;;  %vm177_vm5 = vcmask 1046534   ;;  %v179_v9 = vrot.slane %v152_v63, 1 }
  0x22   :  { %v166_v6 = vsel %vm165_vm1, %v164_v1, %v163_v4  ;;  %vm180_vm6 = vcmask 1047559   ;;  %vm183_vm7 = vcmask 130048  }
  0x23   :  { %v169_v8 = vsel %vm168_vm2, %v167_v2, %v166_v6 }
  0x24   :  { %v172_v10 = vsel %vm171_vm3, %v170_v3, %v169_v8 }
  0x25   :  { %v175_v11 = vsel %vm174_vm4, %v173_v5, %v172_v10 }
  0x26   :  { %v178_v12 = vsel %vm177_vm5, %v176_v7, %v175_v11 }
  0x27   :  { %v181_v13 = vsel %vm180_vm6, %v179_v9, %v178_v12 }
  0x28   :  { %184 = vst.msk [vmem:[#allocation5] sm:$0xff] %vm183_vm7, %v181_v13 }
  0x29   :  { %195 = dma.vmem_to_hbm [thread:$0]  %s191_s13, 128, %s193_s16, [#allocation4]  }
  0x2a   :  { %256 = dma.done.wait [#allocation4], 128  }
  0x2b   :  { %257 = vsyncadd [#allocation4], 4294967168 }
  0x2c   :  { %200 = vsyncpa [#allocation3], 1 }
  0x2d   :  { %201 = vsyncpa [#allocation4], 1 }

</bundles_post_ra>
